<compile_context>
chip_gen: v5e
topology: v5e:2x2
jax: 0.10.0
libtpu: 0.0.40
codegen_flags: <defaults>
</compile_context>

<pallas_src>
import jax
import jax.numpy as jnp
from jax.experimental import pallas as pl
from jax.experimental.pallas import tpu as pltpu


def _global_attention_kernel(qa_ref, qp_ref, ctx_ref, bias_ref, wct_ref,
                             out_ref, m_ref, l_ref, acc_ref):
    """Grid = (batch blocks [parallel], length blocks [arbitrary reduction])."""
    l_idx = pl.program_id(1)

    @pl.when(l_idx == 0)
    def _init():
        m_ref[...] = jnp.full(m_ref.shape, -jnp.inf, jnp.float32)
        l_ref[...] = jnp.zeros(l_ref.shape, jnp.float32)
        acc_ref[...] = jnp.zeros(acc_ref.shape, jnp.float32)

    ctx = ctx_ref[...].astype(jnp.float32)        # (tl, tb, D): b->sublane, d->lane
    qa = qa_ref[...].astype(jnp.float32)          # (tb, D)

    # Scores.  keepdims keeps every (tl, tb, *) intermediate in the SAME
    # (sublane=b, lane=d) layout as the context tile, so the hot loop has no
    # (tl, tb)-sized relayouts; the only XLU work is the D lane-reduction.
    s = jnp.sum(ctx * qa[None, :, :], axis=2, keepdims=True)        # (tl, tb, 1)
    s = s + bias_ref[...].astype(jnp.float32)                       # additive mask bias

    # Online (flash-style) softmax over L; stats kept as (tb, 1) so they
    # broadcast against the (tb, D) accumulator without any transpose.
    m_prev = m_ref[...]                                             # (tb, 1)
    m_new = jnp.maximum(m_prev, jnp.max(s, axis=0))                 # (tb, 1)
    alpha = jnp.exp(m_prev - m_new)                                 # (tb, 1)
    p = jnp.exp(s - m_new[None, :, :])                              # (tl, tb, 1)
    l_ref[...] = alpha * l_ref[...] + jnp.sum(p, axis=0)            # (tb, 1)
    acc_ref[...] = alpha * acc_ref[...] + jnp.sum(p * ctx, axis=0)  # (tb, D)
    m_ref[...] = m_new

    @pl.when(l_idx == pl.num_programs(1) - 1)
    def _finalize():
        # Normalize once here instead of scaling all (B, L) attention weights.
        inv_l = pl.reciprocal(l_ref[...], approx=True)              # (tb, 1), EUP
        weighted = acc_ref[...] * inv_l                             # (tb, D)
        pre = jnp.dot(weighted, wct_ref[...],
                      preferred_element_type=jnp.float32) + qp_ref[...]
        out_ref[...] = jnp.tanh(pre).astype(out_ref.dtype)


def _vmem_limit_bytes():
    """Generation-aware VMEM request: ~48 MiB on v7x (64 MiB/TC), ~96 MiB on v5e/v6e."""
    cap = 64 * 1024 * 1024            # conservative fallback = v7x per-TC VMEM
    try:
        cap = int(getattr(pltpu.get_tpu_info(), "vmem_capacity_bytes", cap))
    except Exception:
        pass
    return min(int(0.75 * cap), 96 * 1024 * 1024)


def _pick_block_b(B):
    cap = min(128, B)
    if B % 2 == 0 and B // 2 >= 8:
        cap = min(cap, B // 2)        # guarantee >=2 b-blocks for v7x megacore
    best = None
    d = 8                             # (8,128) rule: split blocks must be 8-aligned
    while d <= cap:
        if B % d == 0:
            best = d
        d += 8
    return best if best is not None else B


def _pick_block_l(L, D, block_b, ctx_bytes, vmem_limit):
    # Per unit of block_l (per b-block): double-buffered streamed context +
    # ~3 f32-sized compute temporaries (upcast / score / p*ctx) + bias tile.
    per_l = block_b * (D * (2 * ctx_bytes + 3 * 4) + 2 * 2)
    fixed = (2 * D * D * 4                 # resident W_ctx^T (double-buffered)
             + 3 * 2 * block_b * D * 4     # qa / qp / out tiles (double-buffered)
             + block_b * D * 4 + 256)      # accumulator + stats scratch
    budget = int(0.7 * vmem_limit) - fixed
    bl = max(8, budget // max(per_l, 1))
    if bl >= L:
        return L
    return max(8, (bl // 8) * 8)


def global_attention(query, context_lbd, mask_bool, w_align, w_context, w_query,
                     *, alignment_function="general",
                     block_b=None, block_l=None, stream_dtype=jnp.bfloat16):
    """query (B,D), context (L,B,D) [PyTorch layout], mask (B,L) bool or None."""
    B, D = query.shape
    L = context_lbd.shape[0]
    assert context_lbd.shape == (L, B, D)
    if mask_bool is not None:
        assert mask_bool.shape == (B, L)

    # ---- wrapper-side (tiny, L-independent) work --------------------------
    qf = query.astype(jnp.float32)
    if alignment_function == "general":
        qa = jnp.dot(qf, jnp.transpose(w_align).astype(jnp.float32),
                     preferred_element_type=jnp.float32)
    elif alignment_function == "dot":
        qa = qf
    else:
        raise ValueError("Invalid alignment function: {0}".format(alignment_function))
    qp = jnp.dot(qf, jnp.transpose(w_query).astype(jnp.float32),
                 preferred_element_type=jnp.float32)
    wct = jnp.transpose(w_context).astype(jnp.float32)   # kept f32 for exactness

    # Mask -> additive bias in the context's (L, B, 1) orientation/layout.
    if mask_bool is None:
        bias = jnp.zeros((L, B, 1), jnp.float32)
    else:
        bias = jnp.where(mask_bool, -1e30, 0.0).astype(jnp.float32).T[:, :, None]

    ctx = context_lbd
    if stream_dtype is not None and ctx.dtype != stream_dtype:
        ctx = ctx.astype(stream_dtype)    # halve the dominant HBM stream (bf16 default)
    ctx_bytes = jnp.dtype(ctx.dtype).itemsize

    # ---- VMEM- and generation-aware tile selection ------------------------
    vmem_limit = _vmem_limit_bytes()
    if block_b is None:
        block_b = _pick_block_b(B)
    assert B % block_b == 0 and (block_b == B or block_b % 8 == 0)
    if block_l is None:
        block_l = _pick_block_l(L, D, block_b, ctx_bytes, vmem_limit)
    nb = B // block_b
    nl = pl.cdiv(L, block_l)
    l_pad = nl * block_l
    if l_pad != L:                        # ragged L: pad tail and mask it out
        ctx = jnp.pad(ctx, ((0, l_pad - L), (0, 0), (0, 0)))
        bias = jnp.pad(bias, ((0, l_pad - L), (0, 0), (0, 0)),
                       constant_values=-1e30)
    bias = bias.astype(jnp.bfloat16)      # bf16 shares f32's exponent range

    grid_spec = pltpu.PrefetchScalarGridSpec(
        num_scalar_prefetch=0,
        grid=(nb, nl),
        in_specs=[
            pl.BlockSpec((block_b, D), lambda b, l: (b, 0)),               # q @ W_align^T
            pl.BlockSpec((block_b, D), lambda b, l: (b, 0)),               # q @ W_query^T
            pl.BlockSpec((block_l, block_b, D), lambda b, l: (l, b, 0)),   # context (L,B,D)
            pl.BlockSpec((block_l, block_b, 1), lambda b, l: (l, b, 0)),   # mask bias
            pl.BlockSpec((D, D), lambda b, l: (0, 0)),                     # W_ctx^T (resident)
        ],
        out_specs=pl.BlockSpec((block_b, D), lambda b, l: (b, 0)),
        scratch_shapes=[
            pltpu.VMEM((block_b, 1), jnp.float32),    # running max m
            pltpu.VMEM((block_b, 1), jnp.float32),    # running sum l
            pltpu.VMEM((block_b, D), jnp.float32),    # unnormalized weighted context
        ],
    )
    return pl.pallas_call(
        _global_attention_kernel,
        out_shape=jax.ShapeDtypeStruct((B, D), query.dtype),
        grid_spec=grid_spec,
        compiler_params=pltpu.CompilerParams(
            dimension_semantics=("parallel", "arbitrary"),
            vmem_limit_bytes=vmem_limit,
        ),
    )(qa, qp, ctx, bias, wct)


def _reference(query, context_lbd, mask_bool, w_align, w_context, w_query):
    """Pure-JAX replica of the PyTorch forward (for correctness check)."""
    ctx = jnp.transpose(context_lbd, (1, 0, 2)).astype(jnp.float32)   # (B, L, D)
    qa = query @ w_align.T
    align = jnp.einsum("bld,bd->bl", ctx, qa)
    if mask_bool is not None:
        align = jnp.where(mask_bool, -jnp.inf, align)
    attn = jax.nn.softmax(align, axis=1)
    weighted = jnp.einsum("bl,bld->bd", attn, ctx)
    return jnp.tanh(weighted @ w_context.T + query @ w_query.T)


if __name__ == "__main__":
    B, L, D = 2, 20, 32
    key = jax.random.PRNGKey(0)
    k_q, k_c, k_m, k_wa, k_wc, k_wq = jax.random.split(key, 6)

    query = jax.random.normal(k_q, (B, D), dtype=jnp.float32)
    context = jax.random.normal(k_c, (L, B, D), dtype=jnp.float32)    # PyTorch layout
    mask = jax.random.uniform(k_m, (B, L)) < 0.3                      # True = masked
    mask = mask.at[:, 0].set(False)                                   # keep >=1 valid slot

    bound = 1.0 / jnp.sqrt(D)
    w_align = jax.random.uniform(k_wa, (D, D), minval=-bound, maxval=bound, dtype=jnp.float32)
    w_context = jax.random.uniform(k_wc, (D, D), minval=-bound, maxval=bound, dtype=jnp.float32)
    w_query = jax.random.uniform(k_wq, (D, D), minval=-bound, maxval=bound, dtype=jnp.float32)

    ref = _reference(query, context, mask, w_align, w_context, w_query)

    # f32 streaming, block_l=8 -> 3 reduction steps over a padded L=24,
    # exercising the online-softmax + ragged-L path.  Tolerance covers the
    # approximate EUP reciprocal used in the finalize step.
    out32 = global_attention(query, context, mask, w_align, w_context, w_query,
                             block_l=8, stream_dtype=jnp.float32)
    out32 = jax.block_until_ready(out32)
    assert out32.shape == (B, D)
    assert jnp.allclose(out32, ref, atol=1e-2, rtol=0.0), "f32 path mismatch vs reference"

    # Default path: bf16 context stream + auto tile sizing.
    out16 = global_attention(query, context, mask, w_align, w_context, w_query)
    out16 = jax.block_until_ready(out16)
    assert out16.shape == (B, D)
    assert jnp.allclose(out16, ref, atol=5e-2, rtol=0.0), "bf16 path mismatch vs reference"

    print("KERNEL_OK")
</pallas_src>

<mosaic_0001>
module attributes {stable_mosaic.version = 11 : i64} {
  func.func @_global_attention_kernel(%arg0: i32, %arg1: i32, %arg2: memref<2x32xf32, #tpu.memory_space<vmem>>, %arg3: memref<2x32xf32, #tpu.memory_space<vmem>>, %arg4: memref<8x2x32xf32, #tpu.memory_space<vmem>>, %arg5: memref<8x2x1xbf16, #tpu.memory_space<vmem>>, %arg6: memref<32x32xf32, #tpu.memory_space<vmem>>, %arg7: memref<2x32xf32, #tpu.memory_space<vmem>>, %arg8: memref<2x1xf32, #tpu.memory_space<vmem>>, %arg9: memref<2x1xf32, #tpu.memory_space<vmem>>, %arg10: memref<2x32xf32, #tpu.memory_space<vmem>>) attributes {dimension_semantics = [#tpu.dimension_semantics<parallel>, #tpu.dimension_semantics<arbitrary>], iteration_bounds = array<i64: 1, 3>, scalar_prefetch = 0 : i64, scratch_operands = 3 : i64, tpu.core_type = #tpu.core_type<tc>, window_params = [{transform_indices = @transform_0, window_bounds = array<i64: 2, 32>}, {transform_indices = @transform_1, window_bounds = array<i64: 2, 32>}, {transform_indices = @transform_2, window_bounds = array<i64: 8, 2, 32>}, {transform_indices = @transform_3, window_bounds = array<i64: 8, 2, 1>}, {pipeline_mode = #tpu.pipeline_mode<synchronous>, transform_indices = @transform_4, window_bounds = array<i64: 32, 32>}, {transform_indices = @transform_5, window_bounds = array<i64: 2, 32>}]} {
    %c0_i32 = arith.constant 0 : i32
    %0 = arith.cmpi eq, %arg1, %c0_i32 : i32
    %1 = arith.extui %0 : i1 to i32
    %c0_i32_0 = arith.constant 0 : i32
    %2 = arith.cmpi ne, %1, %c0_i32_0 : i32
    scf.if %2 {
      %cst_24 = arith.constant 0xFF800000 : f32
      %39 = vector.broadcast %cst_24 : f32 to vector<2x1xf32>
      %c0_25 = arith.constant 0 : index
      %c0_26 = arith.constant 0 : index
      %40 = vector.load %arg8[%c0_25, %c0_26] : memref<2x1xf32, #tpu.memory_space<vmem>>, vector<2x1xf32>
      tpu.vector_store %arg8[%c0_25, %c0_26], %39 {strides = array<i32>} : memref<2x1xf32, #tpu.memory_space<vmem>>, vector<2x1xf32>,
      %cst_27 = arith.constant 0.000000e+00 : f32
      %41 = vector.broadcast %cst_27 : f32 to vector<2x1xf32>
      %c0_28 = arith.constant 0 : index
      %c0_29 = arith.constant 0 : index
      %42 = vector.load %arg9[%c0_28, %c0_29] : memref<2x1xf32, #tpu.memory_space<vmem>>, vector<2x1xf32>
      tpu.vector_store %arg9[%c0_28, %c0_29], %41 {strides = array<i32>} : memref<2x1xf32, #tpu.memory_space<vmem>>, vector<2x1xf32>,
      %cst_30 = arith.constant 0.000000e+00 : f32
      %43 = vector.broadcast %cst_30 : f32 to vector<2x32xf32>
      %c0_31 = arith.constant 0 : index
      %c0_32 = arith.constant 0 : index
      %44 = vector.load %arg10[%c0_31, %c0_32] : memref<2x32xf32, #tpu.memory_space<vmem>>, vector<2x32xf32>
      tpu.vector_store %arg10[%c0_31, %c0_32], %43 {strides = array<i32>} : memref<2x32xf32, #tpu.memory_space<vmem>>, vector<2x32xf32>,
    } else {
    }
    %c0 = arith.constant 0 : index
    %c0_1 = arith.constant 0 : index
    %c0_2 = arith.constant 0 : index
    %3 = vector.load %arg4[%c0, %c0_1, %c0_2] : memref<8x2x32xf32, #tpu.memory_space<vmem>>, vector<8x2x32xf32>
    %c0_3 = arith.constant 0 : index
    %c0_4 = arith.constant 0 : index
    %4 = vector.load %arg2[%c0_3, %c0_4] : memref<2x32xf32, #tpu.memory_space<vmem>>, vector<2x32xf32>
    %5 = vector.shape_cast %4 : vector<2x32xf32> to vector<1x2x32xf32>
    %6 = vector.broadcast %5 : vector<1x2x32xf32> to vector<8x2x32xf32>
    %7 = arith.mulf %3, %6 : vector<8x2x32xf32>
    %cst = arith.constant dense<0.000000e+00> : vector<8x2xf32>
    %8 = vector.multi_reduction <add>, %7, %cst [2] : vector<8x2x32xf32> to vector<8x2xf32>
    %9 = vector.shape_cast %8 : vector<8x2xf32> to vector<8x2x1xf32>
    %c0_5 = arith.constant 0 : index
    %c0_6 = arith.constant 0 : index
    %c0_7 = arith.constant 0 : index
    %10 = vector.load %arg5[%c0_5, %c0_6, %c0_7] : memref<8x2x1xbf16, #tpu.memory_space<vmem>>, vector<8x2x1xbf16>
    %11 = arith.extf %10 : vector<8x2x1xbf16> to vector<8x2x1xf32>
    %12 = arith.addf %9, %11 : vector<8x2x1xf32>
    %c0_8 = arith.constant 0 : index
    %c0_9 = arith.constant 0 : index
    %13 = vector.load %arg8[%c0_8, %c0_9] : memref<2x1xf32, #tpu.memory_space<vmem>>, vector<2x1xf32>
    %cst_10 = arith.constant dense<0xFF800000> : vector<2x1xf32>
    %14 = vector.multi_reduction <maximumf>, %12, %cst_10 [0] : vector<8x2x1xf32> to vector<2x1xf32>
    %15 = arith.maximumf %13, %14 : vector<2x1xf32>
    %16 = arith.subf %13, %15 : vector<2x1xf32>
    %17 = math.exp %16 : vector<2x1xf32>
    %18 = vector.shape_cast %15 : vector<2x1xf32> to vector<1x2x1xf32>
    %19 = vector.broadcast %18 : vector<1x2x1xf32> to vector<8x2x1xf32>
    %20 = arith.subf %12, %19 : vector<8x2x1xf32>
    %21 = math.exp %20 : vector<8x2x1xf32>
    %c0_11 = arith.constant 0 : index
    %c0_12 = arith.constant 0 : index
    %22 = vector.load %arg9[%c0_11, %c0_12] : memref<2x1xf32, #tpu.memory_space<vmem>>, vector<2x1xf32>
    %23 = arith.mulf %17, %22 : vector<2x1xf32>
    %cst_13 = arith.constant dense<0.000000e+00> : vector<2x1xf32>
    %24 = vector.multi_reduction <add>, %21, %cst_13 [0] : vector<8x2x1xf32> to vector<2x1xf32>
    %25 = arith.addf %23, %24 : vector<2x1xf32>
    %c0_14 = arith.constant 0 : index
    %c0_15 = arith.constant 0 : index
    %26 = vector.load %arg9[%c0_14, %c0_15] : memref<2x1xf32, #tpu.memory_space<vmem>>, vector<2x1xf32>
    tpu.vector_store %arg9[%c0_14, %c0_15], %25 {strides = array<i32>} : memref<2x1xf32, #tpu.memory_space<vmem>>, vector<2x1xf32>,
    %c0_16 = arith.constant 0 : index
    %c0_17 = arith.constant 0 : index
    %27 = vector.load %arg10[%c0_16, %c0_17] : memref<2x32xf32, #tpu.memory_space<vmem>>, vector<2x32xf32>
    %28 = vector.broadcast %17 : vector<2x1xf32> to vector<2x32xf32>
    %29 = arith.mulf %28, %27 : vector<2x32xf32>
    %30 = vector.broadcast %21 : vector<8x2x1xf32> to vector<8x2x32xf32>
    %31 = arith.mulf %30, %3 : vector<8x2x32xf32>
    %cst_18 = arith.constant dense<0.000000e+00> : vector<2x32xf32>
    %32 = vector.multi_reduction <add>, %31, %cst_18 [0] : vector<8x2x32xf32> to vector<2x32xf32>
    %33 = arith.addf %29, %32 : vector<2x32xf32>
    %c0_19 = arith.constant 0 : index
    %c0_20 = arith.constant 0 : index
    %34 = vector.load %arg10[%c0_19, %c0_20] : memref<2x32xf32, #tpu.memory_space<vmem>>, vector<2x32xf32>
    tpu.vector_store %arg10[%c0_19, %c0_20], %33 {strides = array<i32>} : memref<2x32xf32, #tpu.memory_space<vmem>>, vector<2x32xf32>,
    %c0_21 = arith.constant 0 : index
    %c0_22 = arith.constant 0 : index
    %35 = vector.load %arg8[%c0_21, %c0_22] : memref<2x1xf32, #tpu.memory_space<vmem>>, vector<2x1xf32>
    tpu.vector_store %arg8[%c0_21, %c0_22], %15 {strides = array<i32>} : memref<2x1xf32, #tpu.memory_space<vmem>>, vector<2x1xf32>,
    %c2_i32 = arith.constant 2 : i32
    %36 = arith.cmpi eq, %arg1, %c2_i32 : i32
    %37 = arith.extui %36 : i1 to i32
    %c0_i32_23 = arith.constant 0 : i32
    %38 = arith.cmpi ne, %37, %c0_i32_23 : i32
    scf.if %38 {
      %c0_24 = arith.constant 0 : index
      %c0_25 = arith.constant 0 : index
      %39 = vector.load %arg9[%c0_24, %c0_25] : memref<2x1xf32, #tpu.memory_space<vmem>>, vector<2x1xf32>
      %40 = tpu.reciprocal %39 {approx = true} : vector<2x1xf32> -> vector<2x1xf32>
      %c0_26 = arith.constant 0 : index
      %c0_27 = arith.constant 0 : index
      %41 = vector.load %arg10[%c0_26, %c0_27] : memref<2x32xf32, #tpu.memory_space<vmem>>, vector<2x32xf32>
      %42 = vector.broadcast %40 : vector<2x1xf32> to vector<2x32xf32>
      %43 = arith.mulf %41, %42 : vector<2x32xf32>
      %c0_28 = arith.constant 0 : index
      %c0_29 = arith.constant 0 : index
      %44 = vector.load %arg6[%c0_28, %c0_29] : memref<32x32xf32, #tpu.memory_space<vmem>>, vector<32x32xf32>
      %cst_30 = arith.constant dense<0.000000e+00> : vector<2x32xf32>
      %45 = tpu.matmul %43, %44, %cst_30 {dimension_numbers = #tpu.dot_dimension_numbers<[1], [0], [0], [1], [0, 0, 1, 1], [], []>} : vector<2x32xf32>, vector<32x32xf32>, vector<2x32xf32> -> vector<2x32xf32>
      %c0_31 = arith.constant 0 : index
      %c0_32 = arith.constant 0 : index
      %46 = vector.load %arg3[%c0_31, %c0_32] : memref<2x32xf32, #tpu.memory_space<vmem>>, vector<2x32xf32>
      %47 = arith.addf %45, %46 : vector<2x32xf32>
      %48 = math.tanh %47 : vector<2x32xf32>
      %c0_33 = arith.constant 0 : index
      %c0_34 = arith.constant 0 : index
      %49 = vector.load %arg7[%c0_33, %c0_34] : memref<2x32xf32, #tpu.memory_space<vmem>>, vector<2x32xf32>
      tpu.vector_store %arg7[%c0_33, %c0_34], %48 {strides = array<i32>} : memref<2x32xf32, #tpu.memory_space<vmem>>, vector<2x32xf32>,
    } else {
    }
    return
  }
  func.func @transform_0(%arg0: i32, %arg1: i32) -> (i32, i32) {
    %c0_i32 = arith.constant 0 : i32
    %c0_i32_0 = arith.constant 0 : i32
    return %arg0, %c0_i32 : i32, i32
  }
  func.func @transform_1(%arg0: i32, %arg1: i32) -> (i32, i32) {
    %c0_i32 = arith.constant 0 : i32
    %c0_i32_0 = arith.constant 0 : i32
    return %arg0, %c0_i32 : i32, i32
  }
  func.func @transform_2(%arg0: i32, %arg1: i32) -> (i32, i32, i32) {
    %c0_i32 = arith.constant 0 : i32
    %c0_i32_0 = arith.constant 0 : i32
    return %arg1, %arg0, %c0_i32 : i32, i32, i32
  }
  func.func @transform_3(%arg0: i32, %arg1: i32) -> (i32, i32, i32) {
    %c0_i32 = arith.constant 0 : i32
    %c0_i32_0 = arith.constant 0 : i32
    return %arg1, %arg0, %c0_i32 : i32, i32, i32
  }
  func.func @transform_4(%arg0: i32, %arg1: i32) -> (i32, i32) {
    %c0_i32 = arith.constant 0 : i32
    %c0_i32_0 = arith.constant 0 : i32
    %c0_i32_1 = arith.constant 0 : i32
    return %c0_i32, %c0_i32_0 : i32, i32
  }
  func.func @transform_5(%arg0: i32, %arg1: i32) -> (i32, i32) {
    %c0_i32 = arith.constant 0 : i32
    %c0_i32_0 = arith.constant 0 : i32
    return %arg0, %c0_i32 : i32, i32
  }
}

</mosaic_0001>

<bundles_post_ra>
// kernel: tpu_custom_call.1
= control target key start
LH: loop header
LB: loop body
LE: loop exit
PB: predicated region body
PF: predicated region fallthrough
CT: control target
= control target key end

     0   :  { %10 = vsyncpa [#allocation6], 0  ;;  %s1248_s0 = inlined_call_operand.vmem [shape: f32[2,32], index: 0, kind: input, shape index: {}]   ;;  %s1249_s1 = inlined_call_operand.vmem [shape: f32[2,32], index: 1, kind: input, shape index: {}]   ;;  %s1250_s2 = inlined_call_operand.hbm [shape: f32[24,2,32], index: 2, kind: input, shape index: {}]   ;;  %s1251_s3 = inlined_call_operand.vmem [shape: bf16[24,2,1], index: 3, kind: input, shape index: {}]   ;;  %s1252_s4 = inlined_call_operand.hbm [shape: f32[32,32], index: 4, kind: input, shape index: {}]   ;;  %s1253_s5 = inlined_call_operand.hbm [shape: f32[2,32], index: 5, kind: output, shape index: {}]  }
   0x1   :  { %12 = vsyncpa [#allocation6 + $0x1], 0 }
   0x2   :  { %13 = vsyncpa [#allocation9], 0 }
   0x3   :  { %14 = vsyncpa [#allocation7], 0  ;;  %s1033_s18 = smov 0   ;;  %s1035_s19 = smov 0  }
   0x4   :  { %s1037_s20 = smov 0   ;;  %s1039_s21 = smov 0  }
   0x5   :  { %s1041_s22 = smov 0   ;;  %s1043_s23 = smov 0  }
   0x6 LB: > { %s1254_s24 = sadd.s32 4294967295, %s991_s23   ;;  %p106_p0 = scmp.ne.s32.totalorder %s975_s19, %s971_s18  ;;  %s991_s23 = sphi %s1043_s23, %s20_s23   ;;  %s987_s22 = sphi %s1041_s22, %s1264_s22   ;;  %s983_s21 = sphi %s1039_s21, %s1263_s21   ;;  %s979_s20 = sphi %s1037_s20, %s1262_s20   ;;  %s975_s19 = sphi %s1035_s19, %s1261_s19   ;;  %s971_s18 = sphi %s1033_s18, %s1260_s18  }
   0x7   : > { %p1065_p1 = scmp.eq.s32.totalorder %s1254_s24, 0  ;;  %p718_p2 = scmp.ge.s32.totalorder %s991_s23, 1 }
   0x8   : > { %p192_p3 = scmp.lt.s32.totalorder %s991_s23, 4  ;;  %s217_s29 = sshll.u32 %s1252_s4, 4  ;;  %s218_s29 = int_to_ptr.hbm [resolvable:$true] %s217_s29 }
   0x9   : > { %p1073_p4 = por %p1065_p1, %p106_p0  ;;  %s993_s6 = smov [#allocation8]  }
   0xa   : > { %p1080_p5 = pnand %p718_p2, %p192_p3  ;;  %s219_s7 = sshll.u32 %s993_s6, 4  ;;  %s220_s7 = int_to_ptr.vmem [resolvable:$true] %s219_s7 }
   0xb   : > { %s994_s8 = smov 128   ;;  %s995_s9 = smov 8  }
   0xc   : > { %p748_p6 = pneg %p1080_p5  ;;  %s29_s10 = sadd.s32 1, %s987_s22 }
   0xd   : > { %p30_p8 = scmp.ge.s32.totalorder %s29_s10, 3  ;;  %s93_s11 = sadd.s32 1, %s979_s20 }
   0xe   : > { %p749_p7 = pnand %p748_p6, %p1065_p1  ;;  %p100_p9 = scmp.ne.s32.totalorder %s979_s20, %s975_s19 }
   0xf   : > { %p101_p10 = scmp.eq.s32.totalorder %s991_s23, 0  ;;  %s1266_s10 = smov (%p30_p8, %s29_s10), 0 }
  0x10   : > { %751 = dma.hbm_to_vmem [thread:$0]  (!%p749_p7), %s218_s29, 512, %s220_s7, [#allocation9], %s994_s8, %s994_s8, %s995_s9  }
  0x11   : > { %p1095_p11 = por %p101_p10, %p100_p9  ;;  %p757_p12 = scmp.lt.s32.totalorder %s991_s23, 3 }
  0x12   : > { %s88_s13 = ssub.s32 %s987_s22, %s1266_s10  ;;  %s233_s14 = sand.u32 1, %s979_s20  }
  0x13   : > { %p91_p13 = scmp.eq.s32.totalorder %s88_s13, 0  ;;  %s723_s15 = sshll.u32 %s233_s14, 4 }
  0x14   : > { %s737_s16 = sshll.u32 %s987_s22, 4  ;;  %s237_s6 = scalar_lea.vmem [#allocation5], %s723_s15 }
  0x15   : > { %s1105_s17 = scalar_select %p91_p13, %s979_s20, %s93_s11  }
  0x16   : > { %s243_s28 = scalar_lea.hbm %s1250_s2, %s737_s16  ;;  %s246_s7 = sshll.u32 %s237_s6, 4  ;;  %s247_s7 = int_to_ptr.vmem [resolvable:$true] %s246_s7 }
  0x17   : > { %s244_s29 = sshll.u32 %s243_s28, 4  ;;  %p753_p0 = pnand %p757_p12, %p1095_p11  ;;  %s245_s29 = int_to_ptr.hbm [resolvable:$true] %s244_s29 }
  0x18   : > { %s234_s8 = scalar_lea.sflag [#allocation6], %s233_s14  ;;  %s996_s9 = smov 32  }
  0x19   : > { %s997_s24 = smov 2   ;;  %269 = sbr.rel (%p1080_p5) target bundleno = 613 (0x265), region = 40 }
  0x1a   : > { %755 = dma.hbm_to_vmem [thread:$0]  (!%p753_p0), %s245_s29, 256, %s247_s7, %s234_s8, %s996_s9, %s996_s9, %s997_s24  }
  0x1b   : > { %s271_s11 = sand.u32 (!%p1080_p5), 1, %s975_s19  }
  0x1c   : > { %s727_s13 = sshll.u32 (!%p1080_p5), %s271_s11, 4  ;;  %s272_s16 = scalar_lea.sflag (!%p1080_p5), [#allocation6], %s271_s11 }
  0x1d   : > { %s1117_s18 = scalar_lea.vmem (!%p1080_p5), [#allocation5], %s727_s13 }
  0x1e   : > { %958 = dma.done.wait (%p1073_p4), %s272_s16, 256  }
  0x1f   : > { %960 = vsyncadd (%p1073_p4), %s272_s16, 4294967040 }
  0x20   : > { %962 = dma.done.wait (%p1065_p1), [#allocation9], 512  }
  0x21   : > { %964 = vsyncadd (%p1065_p1), [#allocation9], 4294966784  ;;  %s729_s24 = sshll.u32 %s983_s21, 3  ;;  %p730_p3 = scmp.ne.s32.totalorder %s983_s21, 0 }
  0x22   : > { %p328_p2 = scmp.lt.s32.totalorder %s729_s24, 23 }
  0x23   : > { %338 = sbr.rel (%p730_p3) target bundleno = 44 (0x2c), region = 52 }
  0x24   : > { %s1268_s24 = smov (!%p328_p2, %s729_s24), 23 }
  0x25   : > { %s1131_s14 = scalar_lea.vmem %s1251_s3, %s1268_s24 }
  0x28   : > { %vm339_vm0 = vcmask 1024   ;;  %vm342_vm1 = vcmask 254976   ;;  %v998_v0 = vmov -inf   ;;  %v999_v1 = vmov 0.0  }
  0x29   : > { %340 = vst.msk [vmem:[#allocation2] sm:$0x3] %vm339_vm0, %v998_v0 }
  0x2a   : > { %341 = vst.msk [vmem:[#allocation3] sm:$0x3] %vm339_vm0, %v999_v1 }
  0x2b   : > { %343 = vst.msk [vmem:[#allocation4] sm:$0x3] %vm342_vm1, %v999_v1 }
  0x2c PF: > { %v1135_v2 = vld [vmem:[%s1117_s18 + $0x8] sm:$0x3]  ;;  %v352_v3 = vld [vmem:[%s1248_s0] sm:$0x3]  ;;  %vm361_vm2 = vcmask 254976   ;;  %vm411_vm3 = vcmask 1024  }
  0x2d   : > { %v357_v4 = vmul.f32 %v352_v3, %v1135_v2  ;;  %v1142_v5 = vld [vmem:[%s1117_s18 + $0x4] sm:$0x3]  ;;  %v1145_v6 = vld [vmem:[%s1117_s18] sm:$0x3]  ;;  %v1150_v9 = vld [vmem:[%s1117_s18 + $0xa] sm:$0x3] }
  0x2e   : > { %v355_v7 = vmul.f32 %v352_v3, %v1142_v5  ;;  %v353_v8 = vmul.f32 %v352_v3, %v1145_v6  ;;  %v1154_v11 = vld [vmem:[%s1117_s18 + $0x6] sm:$0x3]  ;;  %v1157_v12 = vld [vmem:[%s1117_s18 + $0x2] sm:$0x3]  ;;  %v358_v15 = vmul.f32 %v352_v3, %v1150_v9  ;;  %v1168_v21 = vld [vmem:[%s1117_s18 + $0xe] sm:$0x3] }
  0x2f   : > { %v374_v10 = vsel %vm361_vm2, %v357_v4, 0.0  ;;  %v356_v16 = vmul.f32 %v352_v3, %v1154_v11  ;;  %v354_v17 = vmul.f32 %v352_v3, %v1157_v12  ;;  %v1171_v22 = vld [vmem:[%s1117_s18 + $0xc] sm:$0x3]  ;;  %v360_v23 = vmul.f32 %v352_v3, %v1168_v21  ;;  %v391_v30 = vld [vmem:[%s1131_s14 + $0x5] sm:$0x1]  ;;  %p731_p1 = scmp.ne.s32.totalorder %s983_s21, 2 }
  0x30   : > { %375 = vadd.xlane.f32.xlu2 %v374_v10  ;;  %v368_v13 = vsel %vm361_vm2, %v355_v7, 0.0  ;;  %v362_v14 = vsel %vm361_vm2, %v353_v8, 0.0  ;;  %v377_v18 = vsel %vm361_vm2, %v358_v15, 0.0  ;;  %v359_v24 = vmul.f32 %v352_v3, %v1171_v22  ;;  %v387_v31 = vld [vmem:[%s1131_s14 + $0x1] sm:$0x1] }
  0x31   : > { %369 = vadd.xlane.f32.xlu1 %v368_v13  ;;  %363 = vadd.xlane.f32.xlu0 %v362_v14  ;;  %v371_v19 = vsel %vm361_vm2, %v356_v16, 0.0  ;;  %v365_v20 = vsel %vm361_vm2, %v354_v17, 0.0  ;;  %v383_v25 = vsel %vm361_vm2, %v360_v23, 0.0  ;;  %v390_v32 = vld [vmem:[%s1131_s14 + $0x4] sm:$0x1]  ;;  %v399_v34 = vunpack.c.l.bf16 %v391_v30 }
  0x32   : > { %v380_v26 = vsel %vm361_vm2, %v359_v24, 0.0  ;;  %v386_v33 = vld [vmem:[%s1131_s14] sm:$0x1]  ;;  %v395_v36 = vunpack.c.l.bf16 %v387_v31  ;;  %v388_v37 = vld [vmem:[%s1131_s14 + $0x2] sm:$0x1]  ;;  %v398_v41 = vunpack.c.l.bf16 %v390_v32  ;;  %v1000_v53 = vmov 0  }
  0x33   : > { %v389_v38 = vld [vmem:[%s1131_s14 + $0x3] sm:$0x1]  ;;  %v394_v42 = vunpack.c.l.bf16 %v386_v33  ;;  %v393_v43 = vld [vmem:[%s1131_s14 + $0x7] sm:$0x1]  ;;  %v392_v44 = vld [vmem:[%s1131_s14 + $0x6] sm:$0x1]  ;;  %v396_v45 = vunpack.c.l.bf16 %v388_v37  ;;  %821 = vset.pattern.permute.xlu1 %v1000_v53  ;;  %820 = vset.pattern.permute.xlu0 %v1000_v53 }
  0x34   : > { %v397_v47 = vunpack.c.l.bf16 %v389_v38  ;;  %v401_v49 = vunpack.c.l.bf16 %v393_v43  ;;  %v400_v52 = vunpack.c.l.bf16 %v392_v44  ;;  %819 = vset.pattern.permute.xlu2 %v1000_v53  ;;  %v410_v16 = vld [vmem:[#allocation2] sm:$0x3] }
  0x38   : > { %378 = vadd.xlane.f32.xlu2 %v377_v18 }
  0x39   : > { %372 = vadd.xlane.f32.xlu1 %v371_v19  ;;  %366 = vadd.xlane.f32.xlu0 %v365_v20 }
  0x41   : > { %384 = vadd.xlane.f32.xlu1 %v383_v25  ;;  %381 = vadd.xlane.f32.xlu0 %v380_v26 }
  0xa3   : > { %v376_v27 = vpop.xlane.xlu2 %375 }
  0xa4   : > { %v370_v28 = vpop.xlane.xlu1 %369  ;;  %v364_v29 = vpop.xlane.xlu0 %363  ;;  %v406_v50 = vadd.f32 %v398_v41, %v376_v27 }
  0xa5   : > { %v402_v51 = vadd.f32 %v394_v42, %v364_v29  ;;  %v404_v54 = vadd.f32 %v396_v45, %v370_v28 }
  0xa6   : > { %v416_v60 = vsel %vm411_vm3, %v406_v50, -inf }
  0xa7   : > { %v412_v61 = vsel %vm411_vm3, %v402_v51, -inf  ;;  %v414_v1 = vsel %vm411_vm3, %v404_v54, -inf }
  0xa8   : > { %v417_v8 = vmax.f32 %v412_v61, %v416_v60 }
  0xab   : > { %v379_v35 = vpop.xlane.xlu2 %378 }
  0xac   : > { %v373_v39 = vpop.xlane.xlu1 %372  ;;  %v367_v40 = vpop.xlane.xlu0 %366  ;;  %v407_v46 = vadd.f32 %v399_v34, %v379_v35 }
  0xad   : > { %v403_v48 = vadd.f32 %v395_v36, %v367_v40  ;;  %v405_v56 = vadd.f32 %v397_v47, %v373_v39 }
  0xae   : > { %v418_v55 = vsel %vm411_vm3, %v407_v46, -inf }
  0xaf   : > { %v413_v57 = vsel %vm411_vm3, %v403_v48, -inf  ;;  %v415_v3 = vsel %vm411_vm3, %v405_v56, -inf }
  0xb0   : > { %v419_v0 = vmax.f32 %v413_v57, %v418_v55 }
  0xb2   : > { %v424_v14 = vmax.f32 %v417_v8, %v419_v0 }
  0xb4   : > { %v385_v58 = vpop.xlane.xlu1 %384  ;;  %v382_v59 = vpop.xlane.xlu0 %381 }
  0xb5   : > { %v409_v62 = vadd.f32 %v401_v49, %v385_v58  ;;  %v408_v63 = vadd.f32 %v400_v52, %v382_v59  ;;  %v455_v59 = vld [vmem:[#allocation3] sm:$0x3] }
  0xb7   : > { %v422_v4 = vsel %vm411_vm3, %v409_v62, -inf  ;;  %v420_v7 = vsel %vm411_vm3, %v408_v63, -inf }
  0xb8   : > { %v423_v10 = vmax.f32 %v415_v3, %v422_v4  ;;  %v421_v13 = vmax.f32 %v414_v1, %v420_v7 }
  0xba   : > { %v425_v15 = vmax.f32 %v421_v13, %v423_v10 }
  0xbc   : > { %v426_v17 = vmax.f32 %v424_v14, %v425_v15 }
  0xbe   : > { %v427_v18 = vmax.f32 %v410_v16, %v426_v17 }
  0xc0   : > { %v428_v19 = vsub.f32 %v410_v16, %v427_v18  ;;  %v431_v20 = vsub.f32 %v402_v51, %v427_v18  ;;  %v432_v23 = vsub.f32 %v403_v48, %v427_v18  ;;  %v433_v24 = vsub.f32 %v404_v54, %v427_v18  ;;  %546 = vst.msk [vmem:[#allocation2] sm:$0x3] %vm411_vm3, %v427_v18 }
  0xc1   : > { %v434_v25 = vsub.f32 %v405_v56, %v427_v18  ;;  %v435_v27 = vsub.f32 %v406_v50, %v427_v18  ;;  %v436_v31 = vsub.f32 %v407_v46, %v427_v18  ;;  %v438_v33 = vsub.f32 %v409_v62, %v427_v18 }
  0xc2   : > { %v429_v26 = vmul.f32 1.442695, %v428_v19  ;;  %v439_v28 = vmul.f32 1.442695, %v431_v20  ;;  %v441_v29 = vmul.f32 1.442695, %v432_v23  ;;  %v437_v34 = vsub.f32 %v408_v63, %v427_v18 }
  0xc3   : > { %v443_v30 = vmul.f32 1.442695, %v433_v24  ;;  %v445_v32 = vmul.f32 1.442695, %v434_v25  ;;  %v447_v35 = vmul.f32 1.442695, %v435_v27 }
  0xc4   : > { %822 = vpow2.f32 %v429_v26  ;;  %v449_v36 = vmul.f32 1.442695, %v436_v31  ;;  %v453_v37 = vmul.f32 1.442695, %v438_v33  ;;  %v451_v39 = vmul.f32 1.442695, %v437_v34 }
  0xc5   : > { %824 = vpow2.f32 %v439_v28  ;;  %v474_v34 = vld [vmem:[#allocation4] sm:$0x3] }
  0xc6   : > { %826 = vpow2.f32 %v441_v29 }
  0xc7   : > { %828 = vpow2.f32 %v443_v30 }
  0xc8   : > { %830 = vpow2.f32 %v445_v32 }
  0xc9   : > { %832 = vpow2.f32 %v447_v35 }
  0xca   : > { %v823_v38 = vpop.eup %822  ;;  %834 = vpow2.f32 %v449_v36 }
  0xcb   : > { %v825_v40 = vpop.eup %824  ;;  %477 = vperm.xlu2 %819, %v823_v38   ;;  %836 = vpow2.f32 %v453_v37  ;;  %v456_v63 = vmul.f32 %v823_v38, %v455_v59 }
  0xcc   : > { %v827_v41 = vpop.eup %826  ;;  %v457_v42 = vsel %vm411_vm3, %v825_v40, 0.0  ;;  %483 = vperm.xlu0 %820, %v825_v40   ;;  %838 = vpow2.f32 %v451_v39 }
  0xcd   : > { %v829_v43 = vpop.eup %828  ;;  %v458_v44 = vsel %vm411_vm3, %v827_v41, 0.0  ;;  %488 = vperm.xlu1 %821, %v827_v41  }
  0xce   : > { %v831_v45 = vpop.eup %830  ;;  %v459_v46 = vadd.f32 %v458_v44, %v457_v42  ;;  %v460_v47 = vsel %vm411_vm3, %v829_v43, 0.0 }
  0xcf   : > { %v833_v48 = vpop.eup %832  ;;  %v462_v50 = vsel %vm411_vm3, %v831_v45, 0.0 }
  0xd0   : > { %v461_v49 = vadd.f32 %v460_v47, %v459_v46  ;;  %v835_v51 = vpop.eup %834  ;;  %v464_v54 = vsel %vm411_vm3, %v833_v48, 0.0 }
  0xd1   : > { %v837_v53 = vpop.eup %836  ;;  %v466_v57 = vsel %vm411_vm3, %v835_v51, 0.0 }
  0xd2   : > { %v463_v52 = vadd.f32 %v462_v50, %v461_v49  ;;  %v839_v55 = vpop.eup %838  ;;  %v470_v62 = vsel %vm411_vm3, %v837_v53, 0.0 }
  0xd3   : > { %493 = vperm.xlu2 %819, %v829_v43   ;;  %v468_v60 = vsel %vm411_vm3, %v839_v55, 0.0 }
  0xd4   : > { %v465_v56 = vadd.f32 %v464_v54, %v463_v52  ;;  %518 = vperm.xlu0 %820, %v837_v53  }
  0xd5   : > { %503 = vperm.xlu1 %821, %v833_v48  }
  0xd6   : > { %v467_v58 = vadd.f32 %v466_v57, %v465_v56 }
  0xd8   : > { %v469_v61 = vadd.f32 %v468_v60, %v467_v58 }
  0xda   : > { %v471_v0 = vadd.f32 %v470_v62, %v469_v61 }
  0xdb   : > { %498 = vperm.xlu2 %819, %v831_v45  }
  0xdc   : > { %v472_v1 = vadd.f32 %v471_v0, %v456_v63 }
  0xdd   : > { %513 = vperm.xlu1 %821, %v839_v55  }
  0xde   : > { %473 = vst.msk [vmem:[#allocation3] sm:$0x3] %vm411_vm3, %v472_v1 }
  0xe3   : > { %508 = vperm.xlu2 %819, %v835_v51  }
 0x125   : > { %v478_v3 = vpop.permute.xlu2 %477 }
 0x126   : > { %v480_v37 = vmul.f32 %v478_v3, %v474_v34 }
 0x12d   : > { %v494_v4 = vpop.permute.xlu2 %493 }
 0x12e   : > { %v523_v16 = vmul.f32 %v494_v4, %v1142_v5 }
 0x130   : > { %v532_v19 = vsel %vm361_vm2, %v523_v16, 0.0 }
 0x135   : > { %v499_v8 = vpop.permute.xlu2 %498 }
 0x136   : > { %v524_v20 = vmul.f32 %v499_v8, %v1154_v11 }
 0x13d   : > { %v509_v26 = vpop.permute.xlu2 %508 }
 0x13e   : > { %v484_v7 = vpop.permute.xlu0 %483  ;;  %v526_v28 = vmul.f32 %v509_v26, %v1150_v9 }
 0x13f   : > { %v489_v10 = vpop.permute.xlu1 %488  ;;  %v521_v13 = vmul.f32 %v484_v7, %v1145_v6  ;;  %v534_v6 = vsel %vm361_vm2, %v524_v20, 0.0 }
 0x140   : > { %v522_v14 = vmul.f32 %v489_v10, %v1157_v12  ;;  %v538_v31 = vsel %vm361_vm2, %v526_v28, 0.0 }
 0x141   : > { %v529_v15 = vsel %vm361_vm2, %v521_v13, 0.0 }
 0x142   : > { %v530_v17 = vsel %vm361_vm2, %v522_v14, 0.0 }
 0x143   : > { %v531_v18 = vadd.f32 %v530_v17, %v529_v15 }
 0x145   : > { %v533_v23 = vadd.f32 %v532_v19, %v531_v18 }
 0x146   : > { %v519_v29 = vpop.permute.xlu0 %518 }
 0x147   : > { %v504_v24 = vpop.permute.xlu1 %503  ;;  %v535_v27 = vadd.f32 %v534_v6, %v533_v23  ;;  %v528_v32 = vmul.f32 %v519_v29, %v1168_v21 }
 0x148   : > { %v525_v25 = vmul.f32 %v504_v24, %v1135_v2 }
 0x149   : > { %v542_v36 = vsel %vm361_vm2, %v528_v32, 0.0 }
 0x14a   : > { %v536_v12 = vsel %vm361_vm2, %v525_v25, 0.0 }
 0x14b   : > { %v537_v5 = vadd.f32 %v536_v12, %v535_v27 }
 0x14d   : > { %v539_v33 = vadd.f32 %v538_v31, %v537_v5 }
 0x14f   : > { %v514_v30 = vpop.permute.xlu1 %513 }
 0x150   : > { %v527_v11 = vmul.f32 %v514_v30, %v1171_v22 }
 0x152   : > { %v540_v2 = vsel %vm361_vm2, %v527_v11, 0.0 }
 0x153   : > { %v541_v35 = vadd.f32 %v540_v2, %v539_v33 }
 0x155   : > { %v543_v38 = vadd.f32 %v542_v36, %v541_v35  ;;  %550 = sbr.rel (%p731_p1) target bundleno = 607 (0x25f), region = 56 }
 0x157   : > { %v544_v39 = vadd.f32 %v543_v38, %v480_v37 }
 0x159   : > { %545 = vst.msk [vmem:[#allocation4] sm:$0x3] %vm361_vm2, %v544_v39 }
 0x15a   : > { %v551_v9 = vld [vmem:[#allocation3] sm:$0x3]  ;;  %v562_v21 = vld [vmem:[#allocation8 + $0x10] sm:$0xff]  ;;  %v1001_v41 = vmov 0   ;;  %v561_v22 = vld [vmem:[#allocation8 + $0x8] sm:$0xff]  ;;  %vm565_vm4 = vcmask 261120  }
 0x15b   : > { %v563_v40 = vld [vmem:[#allocation8 + $0x18] sm:$0xff]  ;;  %840 = vset.pattern.permute.xlu0 %v1001_v41  ;;  %841 = vrcp.f32 %v551_v9  ;;  %v560_v43 = vld [vmem:[#allocation8] sm:$0xff] }
 0x15c   : > { %581 = vmatpush.msra.mxu0 %v563_v40  ;;  %v564_v47 = vld [vmem:[%s1249_s1] sm:$0x3] }
 0x15e   : > { %582 = vmatpush.msra.mxu0 %v562_v21 }
 0x160   : > { %583 = vmatpush.msra.mxu0 %v561_v22  ;;  %v553_v44 = vld [vmem:[#allocation4] sm:$0x3] }
 0x161   : > { %v842_v42 = vpop.eup %841 }
 0x162   : > { %556 = vperm.xlu0 %840, %v842_v42   ;;  %584 = vmatpush.msra.mxu0 %v560_v43 }
 0x1d4   : > { %v557_v45 = vpop.permute.xlu0 %556 }
 0x1d5   : > { %v559_v46 = vmul.f32 %v557_v45, %v553_v44 }
 0x1d7   : > { %732 = vmatmul.msk.f32.vlgmr.msra.gmra.mxu0 %vm565_vm4, %v559_v46 }
 0x254   : > { %v586_v48 = vpop.f32.mrf.mxu0 }
 0x255   : > { %v587_v49 = vadd.f32 %v586_v48, %v564_v47 }
 0x257   : > { %843 = vtanh.f32 %v587_v49 }
 0x25d   : > { %v844_v50 = vpop.eup %843 }
 0x25e   : > { %590 = vst.msk [vmem:[#allocation10] sm:$0x3] %vm361_vm2, %v844_v50 }
 0x25f PF: > { %s1259_s27 = sadd.s32 4294967295, %s991_s23   ;;  %s601_s6 = sshll.u32 %s1253_s5, 4  ;;  %s602_s6 = int_to_ptr.hbm [resolvable:$true] %s601_s6 }
 0x260   : > { %p759_p4 = scmp.eq.s32.totalorder %s1259_s27, 2  ;;  %s1002_s7 = smov [#allocation10]  }
 0x261   : > { %s599_s8 = sshll.u32 %s1002_s7, 4  ;;  %s600_s8 = int_to_ptr.vmem [resolvable:$true] %s599_s8 }
 0x262   : > { %745 = dma.vmem_to_hbm [thread:$0]  (%p759_p4), %s600_s8, 32, %s602_s6, [#allocation7]  }
 0x263   : > { %966 = dma.done.wait (%p759_p4), [#allocation7], 32  }
 0x264   : > { %968 = vsyncadd (%p759_p4), [#allocation7], 4294967264 }
 0x265 PF: > { %s20_s23 = sadd.s32 1, %s991_s23   ;;  %s1260_s18 = smov %s975_s19 }
 0x266   : > { %p17_p5 = scmp.ge.s32.totalorder %s20_s23, 5   ;;  %s1261_s19 = smov %s979_s20 }
 0x267   : > { %s1262_s20 = smov %s1105_s17  ;;  %s1263_s21 = smov %s987_s22 }
 0x268   : > { %s1264_s22 = smov %s1266_s10  ;;  %19 = sbr.rel (!%p17_p5) target bundleno = 6 (0x6), region = 99 }
 0x26d   :  { %615 = vsyncpa [#allocation6], 1 }
 0x26e   :  { %617 = vsyncpa [#allocation6 + $0x1], 1 }
 0x26f   :  { %618 = vsyncpa [#allocation9], 1 }
 0x270   :  { %619 = vsyncpa [#allocation7], 1 }
 0x271   :  { %621 = vsyncpa [#allocation7 + $0x1], 1 }

</bundles_post_ra>
